<compile_context>
chip_gen: v7x
topology: tpu7x:2x2x1
jax: 0.10.0
libtpu: 0.0.40
codegen_flags: <defaults>
</compile_context>

<pallas_src>
import jax
import jax.numpy as jnp
from jax.experimental import pallas as pl
from jax.experimental.pallas import tpu as pltpu


NOISE_SIZE = 10
HIDDEN_SIZE = 100
OUTPUT_SIZE = 1

H_PAD = 128          # hidden dim padded to the native 128-lane grain
LANE = 128           # batch grain in the batch-in-lanes layout
MAX_TILE_B = 8192    # ~20 MiB of f32 intermediates per tile; fits all gens


def _round_up(x, m):
    return ((x + m - 1) // m) * m


def _mlp_kernel(x_ref, w1_ref, b1_ref, w2_ref, b2_ref, w3_ref, b3_ref,
                w4_ref, b4_ref, o_ref):
    """Transposed MLP: activations are laid out (features, batch_tile)."""
    f32 = jnp.float32
    bf16 = jnp.bfloat16

    # Layer 1: (H_PAD, NOISE) @ (NOISE, tile_b) MXU matmul, true K = 10.
    h = jnp.dot(w1_ref[...], x_ref[...], preferred_element_type=f32)
    h = jnp.maximum(h + b1_ref[...], 0.0)

    # Layers 2-3: (H_PAD, H_PAD) @ (H_PAD, tile_b), bf16 MXU inputs, f32 acc.
    h = jnp.dot(w2_ref[...], h.astype(bf16), preferred_element_type=f32)
    h = jnp.maximum(h + b2_ref[...], 0.0)

    h = jnp.dot(w3_ref[...], h.astype(bf16), preferred_element_type=f32)
    h = jnp.maximum(h + b3_ref[...], 0.0)

    # Layer 4 (hidden -> 1): f32 VPU multiply + sublane reduce -> lane-dense
    # (1, tile_b) row (avoids a 1-row MXU matmul and masked partial stores).
    out = jnp.sum(h * w4_ref[...], axis=0, keepdims=True) + b4_ref[0, 0]
    o_ref[...] = out


def pad_params(params):
    """One-time packing: transpose to (out_feat, in_feat), zero-pad hidden dim
    to 128 (numerically exact), cast matmul weights to bfloat16."""
    f32, bf16 = jnp.float32, jnp.bfloat16

    def pad2(a, shape):
        return jnp.zeros(shape, a.dtype).at[:a.shape[0], :a.shape[1]].set(a)

    p = {}
    p["w1_t"] = pad2(params["w1"].T.astype(bf16), (H_PAD, NOISE_SIZE))
    p["w2_t"] = pad2(params["w2"].T.astype(bf16), (H_PAD, H_PAD))
    p["w3_t"] = pad2(params["w3"].T.astype(bf16), (H_PAD, H_PAD))
    p["b1"] = pad2(params["b1"].T.astype(f32), (H_PAD, 1))
    p["b2"] = pad2(params["b2"].T.astype(f32), (H_PAD, 1))
    p["b3"] = pad2(params["b3"].T.astype(f32), (H_PAD, 1))
    p["w4_col"] = pad2(params["w4"].astype(f32), (H_PAD, 1))   # (100,1)->(128,1)
    p["b4"] = params["b4"].reshape(1, 1).astype(f32)           # SMEM scalar
    return p


def _plan(batch):
    """Pick (tile_b, grid, padded_batch) for the batch-in-lanes layout."""
    b_pad = _round_up(max(batch, 1), LANE)
    n_tiles = pl.cdiv(b_pad, MAX_TILE_B)        # respect the VMEM-sized tile cap
    if b_pad >= 2 * LANE:                       # >=2 steps so both v7x TCs work
        n_tiles = max(n_tiles, 2)
    if n_tiles > 1 and n_tiles % 2:             # even step count balances 2 TCs
        n_tiles += 1
    tile_b = _round_up(pl.cdiv(b_pad, n_tiles), LANE)
    grid = pl.cdiv(b_pad, tile_b)
    return tile_b, grid, grid * tile_b


@jax.jit
def generator_forward(x, padded_params):
    """Pallas forward pass.  x: (B, NOISE_SIZE) float32 -> (B, 1) float32."""
    B = x.shape[0]
    tile_b, grid, b_full = _plan(B)
    p = padded_params

    # Batch-in-lanes input: (NOISE_SIZE, b_full) bf16.  Transpose + cast + pad
    # is one small fused XLA op (~40 B/row); zero-padded columns are sliced
    # off below and never affect real columns.
    x_t = jnp.pad(x.astype(jnp.bfloat16).T, ((0, 0), (0, b_full - B)))

    const = lambda a: pl.BlockSpec(a.shape, lambda i: (0, 0))

    out = pl.pallas_call(
        _mlp_kernel,
        out_shape=jax.ShapeDtypeStruct((1, b_full), jnp.float32),
        grid=(grid,),
        in_specs=[
            pl.BlockSpec((NOISE_SIZE, tile_b), lambda i: (0, i)),   # x tile
            const(p["w1_t"]), const(p["b1"]),
            const(p["w2_t"]), const(p["b2"]),
            const(p["w3_t"]), const(p["b3"]),
            const(p["w4_col"]),
            pl.BlockSpec(memory_space=pltpu.MemorySpace.SMEM),      # b4 scalar
        ],
        out_specs=pl.BlockSpec((1, tile_b), lambda i: (0, i)),      # lane-dense
        compiler_params=pltpu.CompilerParams(
            dimension_semantics=("parallel",),
            vmem_limit_bytes=48 * 1024 * 1024,
        ),
    )(x_t, p["w1_t"], p["b1"], p["w2_t"], p["b2"], p["w3_t"], p["b3"],
      p["w4_col"], p["b4"])

    return out[0, :B].reshape(B, OUTPUT_SIZE)


def init_params(key, noise_size=NOISE_SIZE, hidden_size=HIDDEN_SIZE,
                output_size=OUTPUT_SIZE):
    """PyTorch nn.Linear-style init (uniform +/- 1/sqrt(fan_in)).  Weights are
    stored (in_features, out_features): out = x @ W + b == x @ W_torch.T + b."""
    dims = [(noise_size, hidden_size),
            (hidden_size, hidden_size),
            (hidden_size, hidden_size),
            (hidden_size, output_size)]
    params = {}
    for i, (fan_in, fan_out) in enumerate(dims, start=1):
        key, kw, kb = jax.random.split(key, 3)
        bound = 1.0 / jnp.sqrt(fan_in)
        params[f"w{i}"] = jax.random.uniform(kw, (fan_in, fan_out), jnp.float32,
                                             -bound, bound)
        params[f"b{i}"] = jax.random.uniform(kb, (1, fan_out), jnp.float32,
                                             -bound, bound)
    return params


def reference_forward(x, params):
    h = jnp.maximum(x @ params["w1"] + params["b1"], 0.0)
    h = jnp.maximum(h @ params["w2"] + params["b2"], 0.0)
    h = jnp.maximum(h @ params["w3"] + params["b3"], 0.0)
    return h @ params["w4"] + params["b4"]


if __name__ == "__main__":
    key = jax.random.PRNGKey(0)
    key, kx = jax.random.split(key)

    params = init_params(key)
    padded = pad_params(params)

    # The kernel uses bf16 MXU inputs with f32 accumulation, so compare against
    # the f32 reference at a bf16-level tolerance (outputs are O(0.1-1),
    # observed error is ~1e-2).
    TOL = 1e-1

    B = 8
    x = jax.random.normal(kx, (B, NOISE_SIZE), jnp.float32)
    out = jax.block_until_ready(generator_forward(x, padded))
    ref = reference_forward(x, params)
    assert out.shape == (B, OUTPUT_SIZE), out.shape
    assert jnp.allclose(out, ref, atol=TOL, rtol=TOL), (
        f"max abs err {jnp.max(jnp.abs(out - ref))}")

    # Awkward batch: not a multiple of 128 -> exercises the padded tail and a
    # 2-step "parallel" grid (both v7x TensorCores).
    B2 = 300
    x2 = jax.random.normal(jax.random.PRNGKey(1), (B2, NOISE_SIZE), jnp.float32)
    out2 = jax.block_until_ready(generator_forward(x2, padded))
    ref2 = reference_forward(x2, params)
    assert out2.shape == (B2, OUTPUT_SIZE), out2.shape
    assert jnp.allclose(out2, ref2, atol=TOL, rtol=TOL), (
        f"max abs err {jnp.max(jnp.abs(out2 - ref2))}")

    print("KERNEL_OK")
</pallas_src>

<mosaic_0001>
module attributes {stable_mosaic.version = 11 : i64} {
  func.func @_mlp_kernel(%arg0: i32, %arg1: memref<10x128xbf16, #tpu.memory_space<vmem>>, %arg2: memref<128x10xbf16, #tpu.memory_space<vmem>>, %arg3: memref<128x1xf32, #tpu.memory_space<vmem>>, %arg4: memref<128x128xbf16, #tpu.memory_space<vmem>>, %arg5: memref<128x1xf32, #tpu.memory_space<vmem>>, %arg6: memref<128x128xbf16, #tpu.memory_space<vmem>>, %arg7: memref<128x1xf32, #tpu.memory_space<vmem>>, %arg8: memref<128x1xf32, #tpu.memory_space<vmem>>, %arg9: memref<1x1xf32, #tpu.memory_space<smem>>, %arg10: memref<1x128xf32, #tpu.memory_space<vmem>>) attributes {dimension_semantics = [#tpu.dimension_semantics<parallel>], iteration_bounds = array<i64: 1>, scalar_prefetch = 0 : i64, scratch_operands = 0 : i64, tpu.core_type = #tpu.core_type<tc>, window_params = [{transform_indices = @transform_0, window_bounds = array<i64: 10, 128>}, {pipeline_mode = #tpu.pipeline_mode<synchronous>, transform_indices = @transform_1, window_bounds = array<i64: 128, 10>}, {pipeline_mode = #tpu.pipeline_mode<synchronous>, transform_indices = @transform_2, window_bounds = array<i64: 128, 1>}, {pipeline_mode = #tpu.pipeline_mode<synchronous>, transform_indices = @transform_3, window_bounds = array<i64: 128, 128>}, {pipeline_mode = #tpu.pipeline_mode<synchronous>, transform_indices = @transform_4, window_bounds = array<i64: 128, 1>}, {pipeline_mode = #tpu.pipeline_mode<synchronous>, transform_indices = @transform_5, window_bounds = array<i64: 128, 128>}, {pipeline_mode = #tpu.pipeline_mode<synchronous>, transform_indices = @transform_6, window_bounds = array<i64: 128, 1>}, {pipeline_mode = #tpu.pipeline_mode<synchronous>, transform_indices = @transform_7, window_bounds = array<i64: 128, 1>}, {transform_indices = @transform_8, window_bounds = array<i64: 1, 1>}, {transform_indices = @transform_9, window_bounds = array<i64: 1, 128>}]} {
    %c0 = arith.constant 0 : index
    %c0_0 = arith.constant 0 : index
    %0 = vector.load %arg2[%c0, %c0_0] : memref<128x10xbf16, #tpu.memory_space<vmem>>, vector<128x10xbf16>
    %c0_1 = arith.constant 0 : index
    %c0_2 = arith.constant 0 : index
    %1 = vector.load %arg1[%c0_1, %c0_2] : memref<10x128xbf16, #tpu.memory_space<vmem>>, vector<10x128xbf16>
    %cst = arith.constant dense<0.000000e+00> : vector<128x128xf32>
    %2 = tpu.matmul %0, %1, %cst {dimension_numbers = #tpu.dot_dimension_numbers<[1], [0], [0], [1], [0, 0, 1, 1], [], []>} : vector<128x10xbf16>, vector<10x128xbf16>, vector<128x128xf32> -> vector<128x128xf32>
    %c0_3 = arith.constant 0 : index
    %c0_4 = arith.constant 0 : index
    %3 = vector.load %arg3[%c0_3, %c0_4] : memref<128x1xf32, #tpu.memory_space<vmem>>, vector<128x1xf32>
    %4 = vector.broadcast %3 : vector<128x1xf32> to vector<128x128xf32>
    %5 = arith.addf %2, %4 : vector<128x128xf32>
    %cst_5 = arith.constant 0.000000e+00 : f32
    %6 = vector.broadcast %cst_5 : f32 to vector<128x128xf32>
    %7 = arith.maximumf %5, %6 : vector<128x128xf32>
    %c0_6 = arith.constant 0 : index
    %c0_7 = arith.constant 0 : index
    %8 = vector.load %arg4[%c0_6, %c0_7] : memref<128x128xbf16, #tpu.memory_space<vmem>>, vector<128x128xbf16>
    %9 = arith.truncf %7 : vector<128x128xf32> to vector<128x128xbf16>
    %cst_8 = arith.constant dense<0.000000e+00> : vector<128x128xf32>
    %10 = tpu.matmul %8, %9, %cst_8 {dimension_numbers = #tpu.dot_dimension_numbers<[1], [0], [0], [1], [0, 0, 1, 1], [], []>} : vector<128x128xbf16>, vector<128x128xbf16>, vector<128x128xf32> -> vector<128x128xf32>
    %c0_9 = arith.constant 0 : index
    %c0_10 = arith.constant 0 : index
    %11 = vector.load %arg5[%c0_9, %c0_10] : memref<128x1xf32, #tpu.memory_space<vmem>>, vector<128x1xf32>
    %12 = vector.broadcast %11 : vector<128x1xf32> to vector<128x128xf32>
    %13 = arith.addf %10, %12 : vector<128x128xf32>
    %cst_11 = arith.constant 0.000000e+00 : f32
    %14 = vector.broadcast %cst_11 : f32 to vector<128x128xf32>
    %15 = arith.maximumf %13, %14 : vector<128x128xf32>
    %c0_12 = arith.constant 0 : index
    %c0_13 = arith.constant 0 : index
    %16 = vector.load %arg6[%c0_12, %c0_13] : memref<128x128xbf16, #tpu.memory_space<vmem>>, vector<128x128xbf16>
    %17 = arith.truncf %15 : vector<128x128xf32> to vector<128x128xbf16>
    %cst_14 = arith.constant dense<0.000000e+00> : vector<128x128xf32>
    %18 = tpu.matmul %16, %17, %cst_14 {dimension_numbers = #tpu.dot_dimension_numbers<[1], [0], [0], [1], [0, 0, 1, 1], [], []>} : vector<128x128xbf16>, vector<128x128xbf16>, vector<128x128xf32> -> vector<128x128xf32>
    %c0_15 = arith.constant 0 : index
    %c0_16 = arith.constant 0 : index
    %19 = vector.load %arg7[%c0_15, %c0_16] : memref<128x1xf32, #tpu.memory_space<vmem>>, vector<128x1xf32>
    %20 = vector.broadcast %19 : vector<128x1xf32> to vector<128x128xf32>
    %21 = arith.addf %18, %20 : vector<128x128xf32>
    %cst_17 = arith.constant 0.000000e+00 : f32
    %22 = vector.broadcast %cst_17 : f32 to vector<128x128xf32>
    %23 = arith.maximumf %21, %22 : vector<128x128xf32>
    %c0_18 = arith.constant 0 : index
    %c0_19 = arith.constant 0 : index
    %24 = vector.load %arg8[%c0_18, %c0_19] : memref<128x1xf32, #tpu.memory_space<vmem>>, vector<128x1xf32>
    %25 = vector.broadcast %24 : vector<128x1xf32> to vector<128x128xf32>
    %26 = arith.mulf %23, %25 : vector<128x128xf32>
    %cst_20 = arith.constant dense<0.000000e+00> : vector<128xf32>
    %27 = vector.multi_reduction <add>, %26, %cst_20 [0] : vector<128x128xf32> to vector<128xf32>
    %28 = vector.shape_cast %27 : vector<128xf32> to vector<1x128xf32>
    %c0_21 = arith.constant 0 : index
    %c0_22 = arith.constant 0 : index
    %29 = memref.load %arg9[%c0_21, %c0_22] : memref<1x1xf32, #tpu.memory_space<smem>>
    %30 = vector.broadcast %29 : f32 to vector<1x128xf32>
    %31 = arith.addf %28, %30 : vector<1x128xf32>
    %c0_23 = arith.constant 0 : index
    %c0_24 = arith.constant 0 : index
    %32 = vector.load %arg10[%c0_23, %c0_24] : memref<1x128xf32, #tpu.memory_space<vmem>>, vector<1x128xf32>
    tpu.vector_store %arg10[%c0_23, %c0_24], %31 {strides = array<i32>} : memref<1x128xf32, #tpu.memory_space<vmem>>, vector<1x128xf32>,
    return
  }
  func.func @transform_0(%arg0: i32) -> (i32, i32) {
    %c0_i32 = arith.constant 0 : i32
    %c0_i32_0 = arith.constant 0 : i32
    return %c0_i32, %arg0 : i32, i32
  }
  func.func @transform_1(%arg0: i32) -> (i32, i32) {
    %c0_i32 = arith.constant 0 : i32
    %c0_i32_0 = arith.constant 0 : i32
    %c0_i32_1 = arith.constant 0 : i32
    return %c0_i32, %c0_i32_0 : i32, i32
  }
  func.func @transform_2(%arg0: i32) -> (i32, i32) {
    %c0_i32 = arith.constant 0 : i32
    %c0_i32_0 = arith.constant 0 : i32
    %c0_i32_1 = arith.constant 0 : i32
    return %c0_i32, %c0_i32_0 : i32, i32
  }
  func.func @transform_3(%arg0: i32) -> (i32, i32) {
    %c0_i32 = arith.constant 0 : i32
    %c0_i32_0 = arith.constant 0 : i32
    %c0_i32_1 = arith.constant 0 : i32
    return %c0_i32, %c0_i32_0 : i32, i32
  }
  func.func @transform_4(%arg0: i32) -> (i32, i32) {
    %c0_i32 = arith.constant 0 : i32
    %c0_i32_0 = arith.constant 0 : i32
    %c0_i32_1 = arith.constant 0 : i32
    return %c0_i32, %c0_i32_0 : i32, i32
  }
  func.func @transform_5(%arg0: i32) -> (i32, i32) {
    %c0_i32 = arith.constant 0 : i32
    %c0_i32_0 = arith.constant 0 : i32
    %c0_i32_1 = arith.constant 0 : i32
    return %c0_i32, %c0_i32_0 : i32, i32
  }
  func.func @transform_6(%arg0: i32) -> (i32, i32) {
    %c0_i32 = arith.constant 0 : i32
    %c0_i32_0 = arith.constant 0 : i32
    %c0_i32_1 = arith.constant 0 : i32
    return %c0_i32, %c0_i32_0 : i32, i32
  }
  func.func @transform_7(%arg0: i32) -> (i32, i32) {
    %c0_i32 = arith.constant 0 : i32
    %c0_i32_0 = arith.constant 0 : i32
    %c0_i32_1 = arith.constant 0 : i32
    return %c0_i32, %c0_i32_0 : i32, i32
  }
  func.func @transform_8(%arg0: i32) -> (i32, i32) {
    %c0_i32 = arith.constant 0 : i32
    %c0_i32_0 = arith.constant 0 : i32
    %c0_i32_1 = arith.constant 0 : i32
    return %c0_i32, %c0_i32_0 : i32, i32
  }
  func.func @transform_9(%arg0: i32) -> (i32, i32) {
    %c0_i32 = arith.constant 0 : i32
    %c0_i32_0 = arith.constant 0 : i32
    return %c0_i32, %arg0 : i32, i32
  }
}

</mosaic_0001>

<bundles_post_ra>
// kernel: generator_forward.1
= control target key start
LH: loop header
LB: loop body
LE: loop exit
PB: predicated region body
PF: predicated region fallthrough
CT: control target
= control target key end

     0   :  { %v1223_v0 = vmov 0   ;;  %vm218_vm0 = vcmask 1044480   ;;  %vm193_vm1 = vcmask 80896   ;;  %s1555_s2 = inlined_call_operand.vmem [shape: f32[128,1], index: 2, kind: input, shape index: {}]   ;;  %s1556_s0 = inlined_call_operand.vmem [shape: bf16[10,128], index: 0, kind: input, shape index: {}]   ;;  %s1557_s1 = inlined_call_operand.vmem [shape: bf16[128,10], index: 1, kind: input, shape index: {}]   ;;  %s1558_s4 = inlined_call_operand.vmem [shape: f32[128,1], index: 4, kind: input, shape index: {}]   ;;  %s1559_s6 = inlined_call_operand.vmem [shape: f32[128,1], index: 6, kind: input, shape index: {}]   ;;  %s1560_s7 = inlined_call_operand.vmem [shape: f32[128,1], index: 7, kind: input, shape index: {}]   ;;  %s1561_s3 = inlined_call_operand.vmem [shape: bf16[128,128], index: 3, kind: input, shape index: {}]   ;;  %s1562_s5 = inlined_call_operand.vmem [shape: bf16[128,128], index: 5, kind: input, shape index: {}]   ;;  %s1563_s8 = inlined_call_operand.<no memory space> [shape: f32[1,1], index: 8, kind: input, shape index: {}]   ;;  %s1564_s9 = inlined_call_operand.vmem [shape: f32[1,128], index: 9, kind: output, shape index: {}]  }
   0x1   :  { %1197 = vset.pattern.permute.xlu1 %v1223_v0  ;;  %1196 = vset.pattern.permute.xlu0 %v1223_v0  ;;  %v54_v1 = vld [vmem:[%s1555_s2 + $0x10] sm:$0xff]  ;;  %v52_v2 = vld [vmem:[%s1555_s2] sm:$0xff]  ;;  %v55_v4 = vld [vmem:[%s1555_s2 + $0x18] sm:$0xff] }
   0x2   :  { %80 = vperm.xlu1 %1197, %v54_v1   ;;  %70 = vperm.xlu0 %1196, %v52_v2   ;;  %v1198_v3 = vld [vmem:[%s1556_s0] sm:$0x1f]   ;;  %v53_v5 = vld [vmem:[%s1555_s2 + $0x8] sm:$0xff]  ;;  %v1201_v11 = vld [vmem:[%s1557_s1 + $0x10] sm:$0xff]  }
   0x3   :  { %1194 = vmatprep.subr.msk.bf16.mxu0 %vm218_vm0, %v1198_v3  ;;  %v220_v6 = vsel %vm218_vm0, %v1198_v3, 0  ;;  %v1199_v7 = vld [vmem:[%s1557_s1] sm:$0xff]   ;;  %v1200_v8 = vld [vmem:[%s1557_s1 + $0x8] sm:$0xff]   ;;  %v59_v12 = vld [vmem:[%s1555_s2 + $0x38] sm:$0xff] }
   0x4   :  { %1113 = vmatpush3.bf16.msra.mxu0 %v220_v6  ;;  %v57_v9 = vld [vmem:[%s1555_s2 + $0x28] sm:$0xff]  ;;  %v56_v10 = vld [vmem:[%s1555_s2 + $0x20] sm:$0xff]  ;;  %1114 = vmatprep.mubr.msk.bf16.mxu0 %vm193_vm1, %v1199_v7  ;;  %v58_v13 = vld [vmem:[%s1555_s2 + $0x30] sm:$0xff] }
   0x5   :  { %v1202_v14 = vld [vmem:[%s1557_s1 + $0x18] sm:$0xff]   ;;  %v1203_v15 = vld [vmem:[%s1557_s1 + $0x20] sm:$0xff]   ;;  %v61_v16 = vld [vmem:[%s1555_s2 + $0x48] sm:$0xff] }
   0x6   :  { %85 = vperm.xlu1 %1197, %v55_v4   ;;  %75 = vperm.xlu0 %1196, %v53_v5   ;;  %v60_v17 = vld [vmem:[%s1555_s2 + $0x40] sm:$0xff]  ;;  %v63_v18 = vld [vmem:[%s1555_s2 + $0x58] sm:$0xff]  ;;  %v62_v19 = vld [vmem:[%s1555_s2 + $0x50] sm:$0xff] }
   0x7   :  { %1115 = vmatmul.mubr.msk.bf16.vlgmr.msra.gmra.mrb[0].mxu0 %vm193_vm1, %v1200_v8  ;;  %v1204_v20 = vld [vmem:[%s1557_s1 + $0x28] sm:$0xff]   ;;  %v1205_v21 = vld [vmem:[%s1557_s1 + $0x30] sm:$0xff]   ;;  %v64_v23 = vld [vmem:[%s1555_s2 + $0x60] sm:$0xff] }
   0x8   :  { %1118 = vmatprep.mubr.msk.bf16.mxu0 %vm193_vm1, %v1201_v11  ;;  %v65_v22 = vld [vmem:[%s1555_s2 + $0x68] sm:$0xff]  ;;  %v67_v24 = vld [vmem:[%s1555_s2 + $0x78] sm:$0xff]  ;;  %v66_v25 = vld [vmem:[%s1555_s2 + $0x70] sm:$0xff] }
   0x9   :  { %v1206_v26 = vld [vmem:[%s1557_s1 + $0x38] sm:$0xff]   ;;  %v360_v27 = vld [vmem:[%s1558_s4 + $0x8] sm:$0xff]  ;;  %v359_v28 = vld [vmem:[%s1558_s4] sm:$0xff] }
   0xa   :  { %95 = vperm.xlu1 %1197, %v57_v9   ;;  %90 = vperm.xlu0 %1196, %v56_v10   ;;  %v362_v29 = vld [vmem:[%s1558_s4 + $0x18] sm:$0xff]  ;;  %v361_v30 = vld [vmem:[%s1558_s4 + $0x10] sm:$0xff]  ;;  %v364_v31 = vld [vmem:[%s1558_s4 + $0x28] sm:$0xff] }
   0xb   :  { %v363_v32 = vld [vmem:[%s1558_s4 + $0x20] sm:$0xff]  ;;  %v366_v33 = vld [vmem:[%s1558_s4 + $0x38] sm:$0xff]  ;;  %v365_v34 = vld [vmem:[%s1558_s4 + $0x30] sm:$0xff] }
   0xc   :  { %v368_v35 = vld [vmem:[%s1558_s4 + $0x48] sm:$0xff]  ;;  %v367_v36 = vld [vmem:[%s1558_s4 + $0x40] sm:$0xff]  ;;  %v370_v37 = vld [vmem:[%s1558_s4 + $0x58] sm:$0xff] }
   0xd   :  { %v369_v38 = vld [vmem:[%s1558_s4 + $0x50] sm:$0xff]  ;;  %v372_v39 = vld [vmem:[%s1558_s4 + $0x68] sm:$0xff]  ;;  %v371_v40 = vld [vmem:[%s1558_s4 + $0x60] sm:$0xff] }
   0xe   :  { %105 = vperm.xlu1 %1197, %v59_v12   ;;  %100 = vperm.xlu0 %1196, %v58_v13   ;;  %v374_v41 = vld [vmem:[%s1558_s4 + $0x78] sm:$0xff]  ;;  %v373_v42 = vld [vmem:[%s1558_s4 + $0x70] sm:$0xff]  ;;  %v641_v43 = vld [vmem:[%s1559_s6 + $0x8] sm:$0xff] }
   0xf   :  { %1119 = vmatmul.mubr.msk.bf16.gmra.mrb[4].mxu0 %vm193_vm1, %v1202_v14  ;;  %v640_v44 = vld [vmem:[%s1559_s6] sm:$0xff]  ;;  %v643_v45 = vld [vmem:[%s1559_s6 + $0x18] sm:$0xff]  ;;  %v642_v46 = vld [vmem:[%s1559_s6 + $0x10] sm:$0xff] }
  0x10   :  { %1122 = vmatprep.mubr.msk.bf16.mxu0 %vm193_vm1, %v1203_v15  ;;  %v897_v47 = vld [vmem:[%s1560_s7] sm:$0xff]  ;;  %v899_v49 = vld [vmem:[%s1560_s7 + $0x10] sm:$0xff]  ;;  %v898_v50 = vld [vmem:[%s1560_s7 + $0x8] sm:$0xff] }
  0x11   :  { %v644_v48 = vld [vmem:[%s1559_s6 + $0x20] sm:$0xff]  ;;  %v900_v51 = vld [vmem:[%s1560_s7 + $0x18] sm:$0xff]  ;;  %v645_v52 = vld [vmem:[%s1559_s6 + $0x28] sm:$0xff] }
  0x12   :  { %115 = vperm.xlu1 %1197, %v61_v16   ;;  %110 = vperm.xlu0 %1196, %v60_v17   ;;  %v901_v53 = vld [vmem:[%s1560_s7 + $0x20] sm:$0xff]  ;;  %v646_v54 = vld [vmem:[%s1559_s6 + $0x30] sm:$0xff]  ;;  %v902_v55 = vld [vmem:[%s1560_s7 + $0x28] sm:$0xff] }
  0x13   :  { %v647_v56 = vld [vmem:[%s1559_s6 + $0x38] sm:$0xff]  ;;  %v903_v57 = vld [vmem:[%s1560_s7 + $0x30] sm:$0xff]  ;;  %v648_v58 = vld [vmem:[%s1559_s6 + $0x40] sm:$0xff] }
  0x14   :  { %v904_v59 = vld [vmem:[%s1560_s7 + $0x38] sm:$0xff]  ;;  %v649_v60 = vld [vmem:[%s1559_s6 + $0x48] sm:$0xff]  ;;  %v905_v61 = vld [vmem:[%s1560_s7 + $0x40] sm:$0xff] }
  0x15   :  { %v650_v62 = vld [vmem:[%s1559_s6 + $0x50] sm:$0xff]  ;;  %v906_v63 = vld [vmem:[%s1560_s7 + $0x48] sm:$0xff]  ;;  %v651_v0 = vld [vmem:[%s1559_s6 + $0x58] sm:$0xff] }
  0x16   :  { %125 = vperm.xlu1 %1197, %v63_v18   ;;  %120 = vperm.xlu0 %1196, %v62_v19   ;;  %v907_v1 = vld [vmem:[%s1560_s7 + $0x50] sm:$0xff]  ;;  %v652_v2 = vld [vmem:[%s1559_s6 + $0x60] sm:$0xff]  ;;  %v908_v3 = vld [vmem:[%s1560_s7 + $0x58] sm:$0xff] }
  0x17   :  { %1123 = vmatmul.mubr.msk.bf16.gmra.mrb[8].mxu0 %vm193_vm1, %v1204_v20  ;;  %v653_v4 = vld [vmem:[%s1559_s6 + $0x68] sm:$0xff]  ;;  %v909_v5 = vld [vmem:[%s1560_s7 + $0x60] sm:$0xff]  ;;  %v654_v6 = vld [vmem:[%s1559_s6 + $0x70] sm:$0xff] }
  0x18   :  { %1126 = vmatprep.mubr.msk.bf16.mxu0 %vm193_vm1, %v1205_v21  ;;  %v910_v7 = vld [vmem:[%s1560_s7 + $0x68] sm:$0xff]  ;;  %v655_v8 = vld [vmem:[%s1559_s6 + $0x78] sm:$0xff]  ;;  %v911_v10 = vld [vmem:[%s1560_s7 + $0x70] sm:$0xff] }
  0x19   :  { %v912_v9 = vld [vmem:[%s1560_s7 + $0x78] sm:$0xff]  ;;  %v1207_v11 = vld [vmem:[%s1561_s3] sm:$0xff]  }
  0x1a   :  { %135 = vperm.xlu1 %1197, %v65_v22   ;;  %130 = vperm.xlu0 %1196, %v64_v23  }
  0x1b   :  { %1146 = vmatprep.mubr.bf16.mxu1 %v1207_v11 }
  0x1e   :  { %145 = vperm.xlu1 %1197, %v67_v24   ;;  %140 = vperm.xlu0 %1196, %v66_v25  }
  0x1f   :  { %1127 = vmatmul.mubr.msk.bf16.gmra.mrb[12].mxu0 %vm193_vm1, %v1206_v26 }
  0x22   :  { %382 = vperm.xlu1 %1197, %v360_v27   ;;  %377 = vperm.xlu0 %1196, %v359_v28  }
  0x26   :  { %392 = vperm.xlu1 %1197, %v362_v29   ;;  %387 = vperm.xlu0 %1196, %v361_v30  }
  0x2a   :  { %402 = vperm.xlu1 %1197, %v364_v31   ;;  %397 = vperm.xlu0 %1196, %v363_v32  }
  0x2e   :  { %412 = vperm.xlu1 %1197, %v366_v33   ;;  %407 = vperm.xlu0 %1196, %v365_v34  }
  0x32   :  { %422 = vperm.xlu1 %1197, %v368_v35   ;;  %417 = vperm.xlu0 %1196, %v367_v36  }
  0x36   :  { %432 = vperm.xlu1 %1197, %v370_v37   ;;  %427 = vperm.xlu0 %1196, %v369_v38  }
  0x3a   :  { %442 = vperm.xlu1 %1197, %v372_v39   ;;  %437 = vperm.xlu0 %1196, %v371_v40  }
  0x3e   :  { %452 = vperm.xlu1 %1197, %v374_v41   ;;  %447 = vperm.xlu0 %1196, %v373_v42  }
  0x42   :  { %663 = vperm.xlu1 %1197, %v641_v43   ;;  %658 = vperm.xlu0 %1196, %v640_v44  }
  0x46   :  { %673 = vperm.xlu1 %1197, %v643_v45   ;;  %668 = vperm.xlu0 %1196, %v642_v46  }
  0x4a   :  { %915 = vperm.xlu1 %1197, %v897_v47   ;;  %678 = vperm.xlu0 %1196, %v644_v48  }
  0x4e   :  { %925 = vperm.xlu1 %1197, %v899_v49   ;;  %920 = vperm.xlu0 %1196, %v898_v50  }
  0x52   :  { %930 = vperm.xlu1 %1197, %v900_v51   ;;  %683 = vperm.xlu0 %1196, %v645_v52  }
  0x56   :  { %935 = vperm.xlu1 %1197, %v901_v53   ;;  %688 = vperm.xlu0 %1196, %v646_v54  }
  0x5a   :  { %940 = vperm.xlu1 %1197, %v902_v55   ;;  %693 = vperm.xlu0 %1196, %v647_v56  }
  0x5e   :  { %945 = vperm.xlu1 %1197, %v903_v57   ;;  %698 = vperm.xlu0 %1196, %v648_v58  }
  0x62   :  { %950 = vperm.xlu1 %1197, %v904_v59   ;;  %703 = vperm.xlu0 %1196, %v649_v60  }
  0x66   :  { %955 = vperm.xlu1 %1197, %v905_v61   ;;  %708 = vperm.xlu0 %1196, %v650_v62  }
  0x6a   :  { %960 = vperm.xlu1 %1197, %v906_v63   ;;  %713 = vperm.xlu0 %1196, %v651_v0  }
  0x6e   :  { %965 = vperm.xlu1 %1197, %v907_v1   ;;  %718 = vperm.xlu0 %1196, %v652_v2  }
  0x72   :  { %970 = vperm.xlu1 %1197, %v908_v3   ;;  %723 = vperm.xlu0 %1196, %v653_v4  }
  0x76   :  { %975 = vperm.xlu1 %1197, %v909_v5   ;;  %728 = vperm.xlu0 %1196, %v654_v6  }
  0x7a   :  { %980 = vperm.xlu1 %1197, %v910_v7   ;;  %733 = vperm.xlu0 %1196, %v655_v8  }
  0x7e   :  { %990 = vperm.xlu1 %1197, %v912_v9   ;;  %985 = vperm.xlu0 %1196, %v911_v10  }
  0x81   :  { %v71_v12 = vpop.permute.xlu0 %70  ;;  %v81_v13 = vpop.permute.xlu1 %80 }
  0x85   :  { %v76_v14 = vpop.permute.xlu0 %75  ;;  %v86_v15 = vpop.permute.xlu1 %85 }
  0x89   :  { %v91_v16 = vpop.permute.xlu0 %90  ;;  %v96_v17 = vpop.permute.xlu1 %95 }
  0x8d   :  { %v101_v19 = vpop.permute.xlu0 %100  ;;  %v106_v22 = vpop.permute.xlu1 %105 }
  0x91   :  { %v111_v30 = vpop.permute.xlu0 %110  ;;  %v116_v35 = vpop.permute.xlu1 %115 }
  0x95   :  { %v121_v43 = vpop.permute.xlu0 %120  ;;  %v126_v47 = vpop.permute.xlu1 %125 }
  0x99   :  { %v131_v55 = vpop.permute.xlu0 %130  ;;  %v136_v60 = vpop.permute.xlu1 %135 }
  0x9d   :  { %v141_v4 = vpop.permute.xlu0 %140  ;;  %v146_v8 = vpop.permute.xlu1 %145 }
  0xda   :  { %v1116_v18 = vpop.f32.mrb[0].mxu0 }
  0xdb   :  { %v256_v20 = vpop.f32.mrb[1].mxu0  ;;  %v265_v21 = vadd.f32 %v1116_v18, %v81_v13 }
  0xdc   :  { %v257_v23 = vadd.f32 %v256_v20, %v71_v12  ;;  %v1117_v24 = vpop.f32.mrb[2].mxu0  ;;  %v1208_v20 = vld [vmem:[%s1561_s3 + $0x8] sm:$0xff]  }
  0xdd   :  { %v268_v25 = vadd.f32 %v1117_v24, %v86_v15  ;;  %v259_v26 = vpop.f32.mrb[3].mxu0  ;;  %v321_v28 = vmax.f32 %v265_v21, 0.0  ;;  %v1209_v21 = vld [vmem:[%s1561_s3 + $0x10] sm:$0xff]   ;;  %v1212_v24 = vld [vmem:[%s1561_s3 + $0x28] sm:$0xff]  }
  0xde   :  { %v260_v27 = vadd.f32 %v259_v26, %v76_v14  ;;  %v319_v31 = vmax.f32 %v257_v23, 0.0  ;;  %v1211_v23 = vld [vmem:[%s1561_s3 + $0x20] sm:$0xff]   ;;  %v1214_v26 = vld [vmem:[%s1561_s3 + $0x38] sm:$0xff]  }
  0xdf   :  { %v322_v29 = vmax.f32 %v268_v25, 0.0  ;;  %v1213_v25 = vld [vmem:[%s1561_s3 + $0x30] sm:$0xff]  }
  0xe0   :  { %v320_v32 = vmax.f32 %v260_v27, 0.0  ;;  %v1215_v27 = vld [vmem:[%s1562_s5] sm:$0xff]  }
  0xe1   :  { %v352_v33 = vpack.c.bf16 %v322_v29, %v321_v28  ;;  %1178 = vmatprep.mubr.bf16.mxu0 %v1215_v27  ;;  %v378_v28 = vpop.permute.xlu0 %377  ;;  %v383_v29 = vpop.permute.xlu1 %382 }
  0xe2   :  { %v1120_v34 = vpop.f32.mrb[4].mxu0  ;;  %v351_v37 = vpack.c.bf16 %v320_v32, %v319_v31 }
  0xe3   :  { %v272_v36 = vpop.f32.mrb[5].mxu0  ;;  %v281_v38 = vadd.f32 %v1120_v34, %v101_v19 }
  0xe4   :  { %v273_v39 = vadd.f32 %v272_v36, %v91_v16  ;;  %v1121_v40 = vpop.f32.mrb[6].mxu0  ;;  %1130 = vmatprep.subr.bf16.mxu1 %v351_v37 }
  0xe5   :  { %v284_v41 = vadd.f32 %v1121_v40, %v106_v22  ;;  %v275_v42 = vpop.f32.mrb[7].mxu0  ;;  %1131 = vmatpush3.bf16.msra.mxu1 %v351_v37  ;;  %v325_v45 = vmax.f32 %v281_v38, 0.0  ;;  %v1210_v22 = vld [vmem:[%s1561_s3 + $0x18] sm:$0xff]   ;;  %v393_v31 = vpop.permute.xlu1 %392 }
  0xe6   :  { %v276_v44 = vadd.f32 %v275_v42, %v96_v17  ;;  %1132 = vmatprep.subr.bf16.mxu1 %v352_v33  ;;  %v323_v48 = vmax.f32 %v273_v39, 0.0 }
  0xe7   :  { %v326_v46 = vmax.f32 %v284_v41, 0.0 }
  0xe8   :  { %v324_v49 = vmax.f32 %v276_v44, 0.0 }
  0xe9   :  { %v354_v50 = vpack.c.bf16 %v326_v46, %v325_v45  ;;  %1133 = vmatpush3.bf16.msra.mxu1 %v352_v33  ;;  %v403_v33 = vpop.permute.xlu1 %402 }
  0xea   :  { %v1124_v51 = vpop.f32.mrb[8].mxu0  ;;  %v353_v52 = vpack.c.bf16 %v324_v49, %v323_v48 }
  0xeb   :  { %v288_v53 = vpop.f32.mrb[9].mxu0  ;;  %v297_v54 = vadd.f32 %v1124_v51, %v121_v43 }
  0xec   :  { %v289_v56 = vadd.f32 %v288_v53, %v111_v30  ;;  %v1125_v57 = vpop.f32.mrb[10].mxu0  ;;  %1134 = vmatprep.subr.bf16.mxu1 %v353_v52  ;;  %v388_v30 = vpop.permute.xlu0 %387 }
  0xed   :  { %v300_v58 = vadd.f32 %v1125_v57, %v126_v47  ;;  %v291_v59 = vpop.f32.mrb[11].mxu0  ;;  %1135 = vmatpush3.bf16.msra.mxu1 %v353_v52  ;;  %v329_v62 = vmax.f32 %v297_v54, 0.0  ;;  %v413_v38 = vpop.permute.xlu1 %412 }
  0xee   :  { %v292_v61 = vadd.f32 %v291_v59, %v116_v35  ;;  %1136 = vmatprep.subr.bf16.mxu1 %v354_v50  ;;  %v327_v0 = vmax.f32 %v289_v56, 0.0 }
  0xef   :  { %v330_v63 = vmax.f32 %v300_v58, 0.0 }
  0xf0   :  { %v328_v1 = vmax.f32 %v292_v61, 0.0  ;;  %v398_v32 = vpop.permute.xlu0 %397 }
  0xf1   :  { %v356_v2 = vpack.c.bf16 %v330_v63, %v329_v62  ;;  %1137 = vmatpush3.bf16.msra.mxu1 %v354_v50  ;;  %v423_v50 = vpop.permute.xlu1 %422 }
  0xf2   :  { %v1128_v3 = vpop.f32.mrb[12].mxu0  ;;  %v355_v5 = vpack.c.bf16 %v328_v1, %v327_v0 }
  0xf3   :  { %v304_v6 = vpop.f32.mrb[13].mxu0  ;;  %v313_v7 = vadd.f32 %v1128_v3, %v141_v4 }
  0xf4   :  { %v305_v9 = vadd.f32 %v304_v6, %v131_v55  ;;  %v1129_v10 = vpop.f32.mrb[14].mxu0  ;;  %1138 = vmatprep.subr.bf16.mxu1 %v355_v5  ;;  %v408_v34 = vpop.permute.xlu0 %407 }
  0xf5   :  { %v316_v11 = vadd.f32 %v1129_v10, %v146_v8  ;;  %v307_v12 = vpop.f32.mrb[15].mxu0  ;;  %1139 = vmatpush3.bf16.msra.mxu1 %v355_v5  ;;  %v333_v14 = vmax.f32 %v313_v7, 0.0  ;;  %v433_v63 = vpop.permute.xlu1 %432 }
  0xf6   :  { %v308_v13 = vadd.f32 %v307_v12, %v136_v60  ;;  %1140 = vmatprep.subr.bf16.mxu1 %v356_v2  ;;  %v331_v16 = vmax.f32 %v305_v9, 0.0 }
  0xf7   :  { %v334_v15 = vmax.f32 %v316_v11, 0.0 }
  0xf8   :  { %v332_v17 = vmax.f32 %v308_v13, 0.0  ;;  %v418_v46 = vpop.permute.xlu0 %417 }
  0xf9   :  { %v358_v18 = vpack.c.bf16 %v334_v15, %v333_v14  ;;  %1141 = vmatpush3.bf16.msra.mxu1 %v356_v2  ;;  %v443_v12 = vpop.permute.xlu1 %442 }
  0xfa   :  { %v357_v19 = vpack.c.bf16 %v332_v17, %v331_v16 }
  0xfc   :  { %1142 = vmatprep.subr.bf16.mxu1 %v357_v19  ;;  %v428_v59 = vpop.permute.xlu0 %427 }
  0xfd   :  { %1143 = vmatpush3.bf16.msra.mxu1 %v357_v19 }
  0xfe   :  { %1144 = vmatprep.subr.bf16.mxu1 %v358_v18 }
 0x100   :  { %v438_v7 = vpop.permute.xlu0 %437 }
 0x101   :  { %1145 = vmatpush3.bf16.msra.mxu1 %v358_v18 }
 0x104   :  { %1147 = vmatmul.mubr.bf16.vlgmr.msra.gmra.mrb[0].mxu1 %v1208_v20  ;;  %v448_v19 = vpop.permute.xlu0 %447 }
 0x105   :  { %1150 = vmatprep.mubr.bf16.mxu1 %v1209_v21 }
 0x10c   :  { %1151 = vmatmul.mubr.bf16.gmra.mrb[4].mxu1 %v1210_v22 }
 0x10d   :  { %1154 = vmatprep.mubr.bf16.mxu1 %v1211_v23 }
 0x114   :  { %1155 = vmatmul.mubr.bf16.gmra.mrb[8].mxu1 %v1212_v24  ;;  %v453_v24 = vpop.permute.xlu1 %452 }
 0x115   :  { %1158 = vmatprep.mubr.bf16.mxu1 %v1213_v25 }
 0x11c   :  { %1159 = vmatmul.mubr.bf16.gmra.mrb[12].mxu1 %v1214_v26 }
 0x1d7   :  { %v1148_v35 = vpop.f32.mrb[0].mxu1 }
 0x1d8   :  { %v546_v36 = vadd.f32 %v1148_v35, %v388_v30  ;;  %v537_v37 = vpop.f32.mrb[1].mxu1 }
 0x1d9   :  { %v538_v39 = vadd.f32 %v537_v37, %v378_v28  ;;  %v1149_v40 = vpop.f32.mrb[2].mxu1  ;;  %v1217_v37 = vld [vmem:[%s1562_s5 + $0x10] sm:$0xff]  }
 0x1da   :  { %v549_v41 = vadd.f32 %v1149_v40, %v393_v31  ;;  %v540_v42 = vpop.f32.mrb[3].mxu1  ;;  %v602_v44 = vmax.f32 %v546_v36, 0.0  ;;  %v1216_v36 = vld [vmem:[%s1562_s5 + $0x8] sm:$0xff]  }
 0x1db   :  { %v541_v43 = vadd.f32 %v540_v42, %v383_v29  ;;  %v600_v47 = vmax.f32 %v538_v39, 0.0  ;;  %v1219_v39 = vld [vmem:[%s1562_s5 + $0x20] sm:$0xff]   ;;  %v1220_v40 = vld [vmem:[%s1562_s5 + $0x28] sm:$0xff]   ;;  %v1222_v42 = vld [vmem:[%s1562_s5 + $0x38] sm:$0xff]  }
 0x1dc   :  { %v603_v45 = vmax.f32 %v549_v41, 0.0  ;;  %v1221_v41 = vld [vmem:[%s1562_s5 + $0x30] sm:$0xff]  }
 0x1dd   :  { %v601_v48 = vmax.f32 %v541_v43, 0.0  ;;  %v659_v43 = vpop.permute.xlu0 %658 }
 0x1de   :  { %v633_v49 = vpack.c.bf16 %v603_v45, %v602_v44  ;;  %v664_v44 = vpop.permute.xlu1 %663 }
 0x1df   :  { %v632_v51 = vpack.c.bf16 %v601_v48, %v600_v47  ;;  %v1152_v52 = vpop.f32.mrb[4].mxu1 }
 0x1e0   :  { %v562_v53 = vadd.f32 %v1152_v52, %v408_v34  ;;  %v553_v54 = vpop.f32.mrb[5].mxu1 }
 0x1e1   :  { %v554_v55 = vadd.f32 %v553_v54, %v398_v32  ;;  %v1153_v56 = vpop.f32.mrb[6].mxu1  ;;  %1162 = vmatprep.subr.bf16.mxu0 %v632_v51  ;;  %v669_v45 = vpop.permute.xlu0 %668 }
 0x1e2   :  { %v565_v57 = vadd.f32 %v1153_v56, %v413_v38  ;;  %v556_v58 = vpop.f32.mrb[7].mxu1  ;;  %1163 = vmatpush3.bf16.msra.mxu0 %v632_v51  ;;  %v606_v61 = vmax.f32 %v562_v53, 0.0  ;;  %v1218_v38 = vld [vmem:[%s1562_s5 + $0x18] sm:$0xff]  }
 0x1e3   :  { %v557_v60 = vadd.f32 %v556_v58, %v403_v33  ;;  %1164 = vmatprep.subr.bf16.mxu0 %v633_v49  ;;  %v604_v0 = vmax.f32 %v554_v55, 0.0 }
 0x1e4   :  { %v607_v62 = vmax.f32 %v565_v57, 0.0 }
 0x1e5   :  { %v605_v1 = vmax.f32 %v557_v60, 0.0  ;;  %v679_v47 = vpop.permute.xlu0 %678 }
 0x1e6   :  { %v635_v2 = vpack.c.bf16 %v607_v62, %v606_v61  ;;  %1165 = vmatpush3.bf16.msra.mxu0 %v633_v49 }
 0x1e7   :  { %v634_v3 = vpack.c.bf16 %v605_v1, %v604_v0  ;;  %v1156_v4 = vpop.f32.mrb[8].mxu1 }
 0x1e8   :  { %v578_v5 = vadd.f32 %v1156_v4, %v428_v59  ;;  %v569_v6 = vpop.f32.mrb[9].mxu1 }
 0x1e9   :  { %v570_v8 = vadd.f32 %v569_v6, %v418_v46  ;;  %v1157_v9 = vpop.f32.mrb[10].mxu1  ;;  %1166 = vmatprep.subr.bf16.mxu0 %v634_v3  ;;  %v674_v46 = vpop.permute.xlu1 %673 }
 0x1ea   :  { %v581_v10 = vadd.f32 %v1157_v9, %v433_v63  ;;  %v572_v11 = vpop.f32.mrb[11].mxu1  ;;  %1167 = vmatpush3.bf16.msra.mxu0 %v634_v3  ;;  %v610_v14 = vmax.f32 %v578_v5, 0.0  ;;  %v921_v49 = vpop.permute.xlu0 %920 }
 0x1eb   :  { %v573_v13 = vadd.f32 %v572_v11, %v423_v50  ;;  %1168 = vmatprep.subr.bf16.mxu0 %v635_v2  ;;  %v608_v16 = vmax.f32 %v570_v8, 0.0 }
 0x1ec   :  { %v611_v15 = vmax.f32 %v581_v10, 0.0 }
 0x1ed   :  { %v609_v17 = vmax.f32 %v573_v13, 0.0  ;;  %v916_v48 = vpop.permute.xlu1 %915 }
 0x1ee   :  { %v637_v18 = vpack.c.bf16 %v611_v15, %v610_v14  ;;  %1169 = vmatpush3.bf16.msra.mxu0 %v635_v2  ;;  %v684_v51 = vpop.permute.xlu0 %683 }
 0x1ef   :  { %v636_v20 = vpack.c.bf16 %v609_v17, %v608_v16  ;;  %v1160_v21 = vpop.f32.mrb[12].mxu1 }
 0x1f0   :  { %v594_v22 = vadd.f32 %v1160_v21, %v448_v19  ;;  %v585_v23 = vpop.f32.mrb[13].mxu1 }
 0x1f1   :  { %v586_v25 = vadd.f32 %v585_v23, %v438_v7  ;;  %v1161_v26 = vpop.f32.mrb[14].mxu1  ;;  %1170 = vmatprep.subr.bf16.mxu0 %v636_v20  ;;  %v926_v50 = vpop.permute.xlu1 %925 }
 0x1f2   :  { %v597_v27 = vadd.f32 %v1161_v26, %v453_v24  ;;  %v588_v28 = vpop.f32.mrb[15].mxu1  ;;  %1171 = vmatpush3.bf16.msra.mxu0 %v636_v20  ;;  %v614_v30 = vmax.f32 %v594_v22, 0.0  ;;  %v689_v53 = vpop.permute.xlu0 %688 }
 0x1f3   :  { %v589_v29 = vadd.f32 %v588_v28, %v443_v12  ;;  %1172 = vmatprep.subr.bf16.mxu0 %v637_v18  ;;  %v612_v32 = vmax.f32 %v586_v25, 0.0 }
 0x1f4   :  { %v615_v31 = vmax.f32 %v597_v27, 0.0 }
 0x1f5   :  { %v613_v33 = vmax.f32 %v589_v29, 0.0  ;;  %v931_v52 = vpop.permute.xlu1 %930 }
 0x1f6   :  { %v639_v34 = vpack.c.bf16 %v615_v31, %v614_v30  ;;  %1173 = vmatpush3.bf16.msra.mxu0 %v637_v18  ;;  %v694_v55 = vpop.permute.xlu0 %693 }
 0x1f7   :  { %v638_v35 = vpack.c.bf16 %v613_v33, %v612_v32 }
 0x1f9   :  { %1174 = vmatprep.subr.bf16.mxu0 %v638_v35  ;;  %v936_v54 = vpop.permute.xlu1 %935 }
 0x1fa   :  { %1175 = vmatpush3.bf16.msra.mxu0 %v638_v35  ;;  %v699_v57 = vpop.permute.xlu0 %698 }
 0x1fb   :  { %1176 = vmatprep.subr.bf16.mxu0 %v639_v34 }
 0x1fd   :  { %v941_v56 = vpop.permute.xlu1 %940 }
 0x1fe   :  { %1177 = vmatpush3.bf16.msra.mxu0 %v639_v34  ;;  %v704_v59 = vpop.permute.xlu0 %703 }
 0x201   :  { %1179 = vmatmul.mubr.bf16.vlgmr.msra.gmra.mrb[16].mxu0 %v1216_v36  ;;  %v946_v58 = vpop.permute.xlu1 %945 }
 0x202   :  { %1182 = vmatprep.mubr.bf16.mxu0 %v1217_v37  ;;  %v709_v61 = vpop.permute.xlu0 %708 }
 0x205   :  { %v951_v60 = vpop.permute.xlu1 %950 }
 0x206   :  { %v714_v4 = vpop.permute.xlu0 %713 }
 0x209   :  { %1183 = vmatmul.mubr.bf16.gmra.mrb[20].mxu0 %v1218_v38  ;;  %v956_v62 = vpop.permute.xlu1 %955 }
 0x20a   :  { %1186 = vmatprep.mubr.bf16.mxu0 %v1219_v39  ;;  %v719_v16 = vpop.permute.xlu0 %718 }
 0x20d   :  { %v961_v9 = vpop.permute.xlu1 %960 }
 0x20e   :  { %v724_v34 = vpop.permute.xlu0 %723 }
 0x211   :  { %1187 = vmatmul.mubr.bf16.gmra.mrb[24].mxu0 %v1220_v40  ;;  %v966_v23 = vpop.permute.xlu1 %965 }
 0x212   :  { %1190 = vmatprep.mubr.bf16.mxu0 %v1221_v41 }
 0x215   :  { %v971_v39 = vpop.permute.xlu1 %970 }
 0x219   :  { %1191 = vmatmul.mubr.bf16.gmra.mrb[28].mxu0 %v1222_v42 }
 0x2d4   :  { %v1180_v63 = vpop.f32.mrb[16].mxu0 }
 0x2d5   :  { %v818_v0 = vpop.f32.mrb[17].mxu0  ;;  %v827_v1 = vadd.f32 %v1180_v63, %v669_v45 }
 0x2d6   :  { %v819_v2 = vadd.f32 %v818_v0, %v659_v43  ;;  %v1181_v3 = vpop.f32.mrb[18].mxu0 }
 0x2d7   :  { %v830_v5 = vadd.f32 %v1181_v3, %v674_v46  ;;  %v821_v6 = vpop.f32.mrb[19].mxu0  ;;  %v883_v10 = vmax.f32 %v827_v1, 0.0 }
 0x2d8   :  { %v881_v7 = vmax.f32 %v819_v2, 0.0  ;;  %v822_v8 = vadd.f32 %v821_v6, %v664_v44 }
 0x2d9   :  { %v884_v12 = vmax.f32 %v830_v5, 0.0  ;;  %v995_v18 = vmul.f32 %v926_v50, %v883_v10 }
 0x2da   :  { %v882_v11 = vmax.f32 %v822_v8, 0.0  ;;  %v993_v13 = vmul.f32 %v916_v48, %v881_v7 }
 0x2db   :  { %v996_v24 = vmul.f32 %v931_v52, %v884_v12  ;;  %v729_v52 = vpop.permute.xlu0 %728 }
 0x2dc   :  { %v994_v14 = vmul.f32 %v921_v49, %v882_v11  ;;  %v1184_v15 = vpop.f32.mrb[20].mxu0 }
 0x2dd   :  { %v834_v17 = vpop.f32.mrb[21].mxu0  ;;  %v843_v20 = vadd.f32 %v1184_v15, %v689_v53 }
 0x2de   :  { %v1009_v19 = vadd.f32 %v994_v14, %v993_v13  ;;  %v835_v21 = vadd.f32 %v834_v17, %v679_v47  ;;  %v1185_v22 = vpop.f32.mrb[22].mxu0 }
 0x2df   :  { %v837_v25 = vpop.f32.mrb[23].mxu0  ;;  %v846_v28 = vadd.f32 %v1185_v22, %v694_v55  ;;  %v887_v30 = vmax.f32 %v843_v20, 0.0 }
 0x2e0   :  { %v1010_v26 = vadd.f32 %v1009_v19, %v995_v18  ;;  %v885_v27 = vmax.f32 %v835_v21, 0.0  ;;  %v838_v29 = vadd.f32 %v837_v25, %v684_v51 }
 0x2e1   :  { %v888_v36 = vmax.f32 %v846_v28, 0.0  ;;  %v999_v41 = vmul.f32 %v946_v58, %v887_v30 }
 0x2e2   :  { %v997_v31 = vmul.f32 %v936_v54, %v885_v27  ;;  %v1011_v32 = vadd.f32 %v1010_v26, %v996_v24  ;;  %v886_v33 = vmax.f32 %v838_v29, 0.0 }
 0x2e3   :  { %v1000_v48 = vmul.f32 %v951_v60, %v888_v36  ;;  %v734_v60 = vpop.permute.xlu0 %733 }
 0x2e4   :  { %v1012_v35 = vadd.f32 %v1011_v32, %v997_v31  ;;  %v998_v37 = vmul.f32 %v941_v56, %v886_v33  ;;  %v1188_v38 = vpop.f32.mrb[24].mxu0  ;;  %v976_v56 = vpop.permute.xlu1 %975  ;;  %v1031_v31 = vstv %s1563_s8 }
 0x2e5   :  { %v850_v40 = vpop.f32.mrb[25].mxu0  ;;  %v859_v43 = vadd.f32 %v1188_v38, %v709_v61 }
 0x2e6   :  { %v1013_v42 = vadd.f32 %v1012_v35, %v998_v37  ;;  %v851_v44 = vadd.f32 %v850_v40, %v699_v57  ;;  %v1189_v45 = vpop.f32.mrb[26].mxu0 }
 0x2e7   :  { %v862_v46 = vadd.f32 %v1189_v45, %v714_v4  ;;  %v853_v47 = vpop.f32.mrb[27].mxu0  ;;  %v891_v53 = vmax.f32 %v859_v43, 0.0  ;;  %v986_v20 = vpop.permute.xlu0 %985 }
 0x2e8   :  { %v1014_v49 = vadd.f32 %v1013_v42, %v999_v41  ;;  %v889_v50 = vmax.f32 %v851_v44, 0.0  ;;  %v854_v51 = vadd.f32 %v853_v47, %v704_v59  ;;  %v981_v12 = vpop.permute.xlu1 %980 }
 0x2e9   :  { %v892_v0 = vmax.f32 %v862_v46, 0.0  ;;  %v1003_v61 = vmul.f32 %v966_v23, %v891_v53 }
 0x2ea   :  { %v1001_v54 = vmul.f32 %v956_v62, %v889_v50  ;;  %v1015_v55 = vadd.f32 %v1014_v49, %v1000_v48  ;;  %v890_v63 = vmax.f32 %v854_v51, 0.0 }
 0x2eb   :  { %v1004_v7 = vmul.f32 %v971_v39, %v892_v0 }
 0x2ec   :  { %v1016_v1 = vadd.f32 %v1015_v55, %v1001_v54  ;;  %v1002_v2 = vmul.f32 %v961_v9, %v890_v63  ;;  %v1192_v58 = vpop.f32.mrb[28].mxu0 }
 0x2ed   :  { %v866_v3 = vpop.f32.mrb[29].mxu0  ;;  %v875_v5 = vadd.f32 %v1192_v58, %v729_v52 }
 0x2ee   :  { %v1017_v57 = vadd.f32 %v1016_v1, %v1002_v2  ;;  %v867_v4 = vadd.f32 %v866_v3, %v719_v16  ;;  %v1193_v6 = vpop.f32.mrb[30].mxu0  ;;  %v991_v16 = vpop.permute.xlu1 %990 }
 0x2ef   :  { %v869_v8 = vpop.f32.mrb[31].mxu0  ;;  %v878_v11 = vadd.f32 %v1193_v6, %v734_v60  ;;  %v895_v13 = vmax.f32 %v875_v5, 0.0 }
 0x2f0   :  { %v1018_v59 = vadd.f32 %v1017_v57, %v1003_v61  ;;  %v893_v10 = vmax.f32 %v867_v4, 0.0  ;;  %v870_v62 = vadd.f32 %v869_v8, %v724_v34 }
 0x2f1   :  { %v896_v18 = vmax.f32 %v878_v11, 0.0  ;;  %v1007_v21 = vmul.f32 %v986_v20, %v895_v13 }
 0x2f2   :  { %v1005_v14 = vmul.f32 %v976_v56, %v893_v10  ;;  %v1019_v15 = vadd.f32 %v1018_v59, %v1004_v7  ;;  %v894_v17 = vmax.f32 %v870_v62, 0.0 }
 0x2f3   :  { %v1008_v23 = vmul.f32 %v991_v16, %v896_v18 }
 0x2f4   :  { %v1020_v9 = vadd.f32 %v1019_v15, %v1005_v14  ;;  %v1006_v19 = vmul.f32 %v981_v12, %v894_v17 }
 0x2f6   :  { %v1021_v22 = vadd.f32 %v1020_v9, %v1006_v19 }
 0x2f8   :  { %v1022_v24 = vadd.f32 %v1021_v22, %v1007_v21 }
 0x2fa   :  { %v1023_v25 = vadd.f32 %v1022_v24, %v1008_v23 }
 0x2fc   :  { %v1024_v26 = vrot.slane %v1023_v25, 4 }
 0x2fe   :  { %v1025_v27 = vadd.f32 %v1024_v26, %v1023_v25 }
 0x300   :  { %v1026_v28 = vrot.slane %v1025_v27, 2 }
 0x302   :  { %v1027_v29 = vadd.f32 %v1026_v28, %v1025_v27 }
 0x304   :  { %v1028_v30 = vrot.slane %v1027_v29, 1 }
 0x306   :  { %v1029_v32 = vadd.f32 %v1028_v30, %v1027_v29 }
 0x308   :  { %v1032_v33 = vadd.f32 %v1031_v31, %v1029_v32 }
 0x30a   :  { %1033 = vst [vmem:[%s1564_s9] sm:$0x1] %v1032_v33 }

</bundles_post_ra>
